<compile_context>
chip_gen: v7x
topology: tpu7x:2x2x1
jax: 0.10.0
libtpu: 0.0.40
codegen_flags: <defaults>
</compile_context>

<pallas_src>
import math

import jax
import jax.numpy as jnp
from jax.experimental import pallas as pl
from jax.experimental.pallas import tpu as pltpu

STATE_DIM = 32          # synthetic state dimension (env observation size)
ACTION_DIM = 1          # forward() concatenates action.unsqueeze(-1) -> 1 feature
BATCH = 8
EMBED = 256
HEADS = 4
HEAD_DIM = EMBED // HEADS


def transition_kernel(state_ref, action_ref, w1s_ref, w1a_ref, b1_ref,
                      wf_ref, bf_ref, out_ref):
    # fc: Linear([state, action], 256) + ReLU.  The concat is folded into a
    # matmul over state plus a rank-1 action term (exact split of w1).
    h = jnp.dot(state_ref[...], w1s_ref[...], preferred_element_type=jnp.float32)
    h = h + action_ref[...] * w1a_ref[...] + b1_ref[...]
    h = jnp.maximum(h, 0.0)                                        # (TB, 256)

    # MultiheadAttention over a length-1 sequence: softmax over the single key
    # is exactly 1, so attn_output == V.  V -> out_proj -> fc_out collapses
    # into the single fused weight wf / bias bf precomputed at init.
    out_ref[...] = (jnp.dot(h, wf_ref[...], preferred_element_type=jnp.float32)
                    + bf_ref[...])                                 # (TB, STATE_DIM)


def init_params(key):
    """Raw module parameters (same set the PyTorch module owns)."""
    ks = jax.random.split(key, 12)
    p = {}
    # fc: Linear(STATE_DIM + ACTION_DIM, 256)   (stored transposed: (in, out))
    p["w1"] = jax.random.normal(ks[0], (STATE_DIM + ACTION_DIM, EMBED), jnp.float32) * 0.05
    p["b1"] = jax.random.normal(ks[1], (1, EMBED), jnp.float32) * 0.01
    # MultiheadAttention in_proj (q, k, v) and out_proj, all (256, 256)
    p["wq"] = jax.random.normal(ks[2], (EMBED, EMBED), jnp.float32) * 0.05
    p["bq"] = jax.random.normal(ks[3], (1, EMBED), jnp.float32) * 0.01
    p["wk"] = jax.random.normal(ks[4], (EMBED, EMBED), jnp.float32) * 0.05
    p["bk"] = jax.random.normal(ks[5], (1, EMBED), jnp.float32) * 0.01
    p["wv"] = jax.random.normal(ks[6], (EMBED, EMBED), jnp.float32) * 0.05
    p["bv"] = jax.random.normal(ks[7], (1, EMBED), jnp.float32) * 0.01
    p["wo"] = jax.random.normal(ks[8], (EMBED, EMBED), jnp.float32) * 0.05
    p["bo"] = jax.random.normal(ks[9], (1, EMBED), jnp.float32) * 0.01
    # fc_out: Linear(256, STATE_DIM)
    p["w2"] = jax.random.normal(ks[10], (EMBED, STATE_DIM), jnp.float32) * 0.05
    p["b2"] = jax.random.normal(ks[11], (1, STATE_DIM), jnp.float32) * 0.01
    return p


def prepare_params(p):
    """One-time (init-time) algebraic folding of the inference weights.

    Since the attention acts on a length-1 sequence its weights are exactly 1,
    so  out = relu(x@w1+b1) @ (wv@wo@w2) + ((bv@wo+bo)@w2 + b2).
    wq/wk/bq/bk never influence the output and are dropped from the kernel.
    """
    wf = p["wv"] @ p["wo"] @ p["w2"]                          # (256, STATE_DIM)
    bf = (p["bv"] @ p["wo"] + p["bo"]) @ p["w2"] + p["b2"]    # (1, STATE_DIM)
    return {
        "w1s": p["w1"][:STATE_DIM, :],    # (STATE_DIM, 256)  state rows of w1
        "w1a": p["w1"][STATE_DIM:, :],    # (1, 256)          action row of w1
        "b1": p["b1"],                    # (1, 256)
        "wf": wf,                         # (256, STATE_DIM)
        "bf": bf,                         # (1, STATE_DIM)
    }


def transition_forward(state, action, fused):
    B = state.shape[0]
    tb = B if B <= 128 else 128           # batch tile (single tile at B=8)
    assert B % tb == 0, "batch must tile evenly"
    grid = (B // tb,)

    action2d = action.astype(jnp.float32)[:, None]   # the .unsqueeze(-1)

    def batch_spec(shape):                # tiled over the batch grid axis
        return pl.BlockSpec(shape, lambda i: (i, 0))

    def resident(shape):                  # constant block index -> DMA'd once
        return pl.BlockSpec(shape, lambda i: (0, 0))

    return pl.pallas_call(
        transition_kernel,
        out_shape=jax.ShapeDtypeStruct((B, STATE_DIM), jnp.float32),
        grid=grid,
        in_specs=[
            batch_spec((tb, STATE_DIM)),          # state
            batch_spec((tb, ACTION_DIM)),         # action column
            resident((STATE_DIM, EMBED)),         # w1 (state rows)
            resident((ACTION_DIM, EMBED)),        # w1 (action row)
            resident((1, EMBED)),                 # b1
            resident((EMBED, STATE_DIM)),         # fused wv@wo@w2
            resident((1, STATE_DIM)),             # fused bias
        ],
        out_specs=batch_spec((tb, STATE_DIM)),
        compiler_params=pltpu.CompilerParams(
            dimension_semantics=("parallel",)),   # both TCs on v7x when B scales
    )(state, action2d, fused["w1s"], fused["w1a"], fused["b1"],
      fused["wf"], fused["bf"])


def transition_forward_ref(state, action, p):
    """Plain-JAX reference mirroring the PyTorch forward (unfused, with Q/K)."""
    x = jnp.concatenate([state, action[:, None].astype(jnp.float32)], axis=-1)
    h = jax.nn.relu(x @ p["w1"] + p["b1"])
    q = h @ p["wq"] + p["bq"]
    k = h @ p["wk"] + p["bk"]
    v = h @ p["wv"] + p["bv"]
    B = state.shape[0]
    qh = q.reshape(B, HEADS, HEAD_DIM)
    kh = k.reshape(B, HEADS, HEAD_DIM)
    vh = v.reshape(B, HEADS, HEAD_DIM)
    scores = jnp.sum(qh * kh, axis=-1, keepdims=True) / math.sqrt(HEAD_DIM)
    weights = jax.nn.softmax(scores, axis=-1)          # length-1 key axis -> 1.0
    ctx = (weights * vh).reshape(B, EMBED)
    attn = ctx @ p["wo"] + p["bo"]
    return attn @ p["w2"] + p["b2"]


if __name__ == "__main__":
    key = jax.random.PRNGKey(0)
    k_state, k_action, k_params = jax.random.split(key, 3)

    state = jax.random.normal(k_state, (BATCH, STATE_DIM), jnp.float32)
    action = jax.random.randint(k_action, (BATCH,), 0, 4).astype(jnp.float32)
    params = init_params(k_params)
    fused = prepare_params(params)        # one-time weight folding, not per call

    out = transition_forward(state, action, fused)
    out = jax.block_until_ready(out)

    ref = transition_forward_ref(state, action, params)
    assert out.shape == (BATCH, STATE_DIM)
    assert jnp.allclose(out, ref, atol=1e-3, rtol=1e-3), "mismatch vs JAX reference"

    print("KERNEL_OK")
</pallas_src>

<mosaic_0001>
module attributes {stable_mosaic.version = 11 : i64} {
  func.func @transition_kernel(%arg0: i32, %arg1: memref<8x32xf32, #tpu.memory_space<vmem>>, %arg2: memref<8x1xf32, #tpu.memory_space<vmem>>, %arg3: memref<32x256xf32, #tpu.memory_space<vmem>>, %arg4: memref<1x256xf32, #tpu.memory_space<vmem>>, %arg5: memref<1x256xf32, #tpu.memory_space<vmem>>, %arg6: memref<256x32xf32, #tpu.memory_space<vmem>>, %arg7: memref<1x32xf32, #tpu.memory_space<vmem>>, %arg8: memref<8x32xf32, #tpu.memory_space<vmem>>) attributes {dimension_semantics = [#tpu.dimension_semantics<parallel>], iteration_bounds = array<i64: 1>, scalar_prefetch = 0 : i64, scratch_operands = 0 : i64, tpu.core_type = #tpu.core_type<tc>, window_params = [{transform_indices = @transform_0, window_bounds = array<i64: 8, 32>}, {transform_indices = @transform_1, window_bounds = array<i64: 8, 1>}, {pipeline_mode = #tpu.pipeline_mode<synchronous>, transform_indices = @transform_2, window_bounds = array<i64: 32, 256>}, {pipeline_mode = #tpu.pipeline_mode<synchronous>, transform_indices = @transform_3, window_bounds = array<i64: 1, 256>}, {pipeline_mode = #tpu.pipeline_mode<synchronous>, transform_indices = @transform_4, window_bounds = array<i64: 1, 256>}, {pipeline_mode = #tpu.pipeline_mode<synchronous>, transform_indices = @transform_5, window_bounds = array<i64: 256, 32>}, {pipeline_mode = #tpu.pipeline_mode<synchronous>, transform_indices = @transform_6, window_bounds = array<i64: 1, 32>}, {transform_indices = @transform_7, window_bounds = array<i64: 8, 32>}]} {
    %c0 = arith.constant 0 : index
    %c0_0 = arith.constant 0 : index
    %0 = vector.load %arg1[%c0, %c0_0] : memref<8x32xf32, #tpu.memory_space<vmem>>, vector<8x32xf32>
    %c0_1 = arith.constant 0 : index
    %c0_2 = arith.constant 0 : index
    %1 = vector.load %arg3[%c0_1, %c0_2] : memref<32x256xf32, #tpu.memory_space<vmem>>, vector<32x256xf32>
    %cst = arith.constant dense<0.000000e+00> : vector<8x256xf32>
    %2 = tpu.matmul %0, %1, %cst {dimension_numbers = #tpu.dot_dimension_numbers<[1], [0], [0], [1], [0, 0, 1, 1], [], []>} : vector<8x32xf32>, vector<32x256xf32>, vector<8x256xf32> -> vector<8x256xf32>
    %c0_3 = arith.constant 0 : index
    %c0_4 = arith.constant 0 : index
    %3 = vector.load %arg2[%c0_3, %c0_4] : memref<8x1xf32, #tpu.memory_space<vmem>>, vector<8x1xf32>
    %c0_5 = arith.constant 0 : index
    %c0_6 = arith.constant 0 : index
    %4 = vector.load %arg4[%c0_5, %c0_6] : memref<1x256xf32, #tpu.memory_space<vmem>>, vector<1x256xf32>
    %5 = vector.broadcast %3 : vector<8x1xf32> to vector<8x256xf32>
    %6 = vector.broadcast %4 : vector<1x256xf32> to vector<8x256xf32>
    %7 = arith.mulf %5, %6 : vector<8x256xf32>
    %8 = arith.addf %2, %7 : vector<8x256xf32>
    %c0_7 = arith.constant 0 : index
    %c0_8 = arith.constant 0 : index
    %9 = vector.load %arg5[%c0_7, %c0_8] : memref<1x256xf32, #tpu.memory_space<vmem>>, vector<1x256xf32>
    %10 = vector.broadcast %9 : vector<1x256xf32> to vector<8x256xf32>
    %11 = arith.addf %8, %10 : vector<8x256xf32>
    %cst_9 = arith.constant 0.000000e+00 : f32
    %12 = vector.broadcast %cst_9 : f32 to vector<8x256xf32>
    %13 = arith.maximumf %11, %12 : vector<8x256xf32>
    %c0_10 = arith.constant 0 : index
    %c0_11 = arith.constant 0 : index
    %14 = vector.load %arg6[%c0_10, %c0_11] : memref<256x32xf32, #tpu.memory_space<vmem>>, vector<256x32xf32>
    %cst_12 = arith.constant dense<0.000000e+00> : vector<8x32xf32>
    %15 = tpu.matmul %13, %14, %cst_12 {dimension_numbers = #tpu.dot_dimension_numbers<[1], [0], [0], [1], [0, 0, 1, 1], [], []>} : vector<8x256xf32>, vector<256x32xf32>, vector<8x32xf32> -> vector<8x32xf32>
    %c0_13 = arith.constant 0 : index
    %c0_14 = arith.constant 0 : index
    %16 = vector.load %arg7[%c0_13, %c0_14] : memref<1x32xf32, #tpu.memory_space<vmem>>, vector<1x32xf32>
    %17 = vector.broadcast %16 : vector<1x32xf32> to vector<8x32xf32>
    %18 = arith.addf %15, %17 : vector<8x32xf32>
    %c0_15 = arith.constant 0 : index
    %c0_16 = arith.constant 0 : index
    %19 = vector.load %arg8[%c0_15, %c0_16] : memref<8x32xf32, #tpu.memory_space<vmem>>, vector<8x32xf32>
    tpu.vector_store %arg8[%c0_15, %c0_16], %18 {strides = array<i32>} : memref<8x32xf32, #tpu.memory_space<vmem>>, vector<8x32xf32>,
    return
  }
  func.func @transform_0(%arg0: i32) -> (i32, i32) {
    %c0_i32 = arith.constant 0 : i32
    %c0_i32_0 = arith.constant 0 : i32
    return %arg0, %c0_i32 : i32, i32
  }
  func.func @transform_1(%arg0: i32) -> (i32, i32) {
    %c0_i32 = arith.constant 0 : i32
    %c0_i32_0 = arith.constant 0 : i32
    return %arg0, %c0_i32 : i32, i32
  }
  func.func @transform_2(%arg0: i32) -> (i32, i32) {
    %c0_i32 = arith.constant 0 : i32
    %c0_i32_0 = arith.constant 0 : i32
    %c0_i32_1 = arith.constant 0 : i32
    return %c0_i32, %c0_i32_0 : i32, i32
  }
  func.func @transform_3(%arg0: i32) -> (i32, i32) {
    %c0_i32 = arith.constant 0 : i32
    %c0_i32_0 = arith.constant 0 : i32
    %c0_i32_1 = arith.constant 0 : i32
    return %c0_i32, %c0_i32_0 : i32, i32
  }
  func.func @transform_4(%arg0: i32) -> (i32, i32) {
    %c0_i32 = arith.constant 0 : i32
    %c0_i32_0 = arith.constant 0 : i32
    %c0_i32_1 = arith.constant 0 : i32
    return %c0_i32, %c0_i32_0 : i32, i32
  }
  func.func @transform_5(%arg0: i32) -> (i32, i32) {
    %c0_i32 = arith.constant 0 : i32
    %c0_i32_0 = arith.constant 0 : i32
    %c0_i32_1 = arith.constant 0 : i32
    return %c0_i32, %c0_i32_0 : i32, i32
  }
  func.func @transform_6(%arg0: i32) -> (i32, i32) {
    %c0_i32 = arith.constant 0 : i32
    %c0_i32_0 = arith.constant 0 : i32
    %c0_i32_1 = arith.constant 0 : i32
    return %c0_i32, %c0_i32_0 : i32, i32
  }
  func.func @transform_7(%arg0: i32) -> (i32, i32) {
    %c0_i32 = arith.constant 0 : i32
    %c0_i32_0 = arith.constant 0 : i32
    return %arg0, %c0_i32 : i32, i32
  }
}

</mosaic_0001>

<bundles_post_ra>
// kernel: tpu_custom_call.1
= control target key start
LH: loop header
LB: loop body
LE: loop exit
PB: predicated region body
PF: predicated region fallthrough
CT: control target
= control target key end

     0   :  { %v376_v7 = vmov 0.0   ;;  %v377_v8 = vmov 0   ;;  %vm56_vm0 = vcmask 261120   ;;  %s568_s0 = inlined_call_operand.vmem [shape: f32[8,32], index: 0, kind: input, shape index: {}]   ;;  %s569_s1 = inlined_call_operand.vmem [shape: f32[8,1], index: 1, kind: input, shape index: {}]   ;;  %s570_s2 = inlined_call_operand.vmem [shape: f32[32,256], index: 2, kind: input, shape index: {}]   ;;  %s571_s3 = inlined_call_operand.vmem [shape: f32[1,256], index: 3, kind: input, shape index: {}]   ;;  %s572_s4 = inlined_call_operand.vmem [shape: f32[1,256], index: 4, kind: input, shape index: {}]   ;;  %s573_s5 = inlined_call_operand.vmem [shape: f32[256,32], index: 5, kind: input, shape index: {}]   ;;  %s574_s6 = inlined_call_operand.vmem [shape: f32[1,32], index: 6, kind: input, shape index: {}]   ;;  %s575_s7 = inlined_call_operand.hbm [shape: f32[8,32], index: 7, kind: output, shape index: {}]  }
   0x1   :  { %v29_v0 = vld [vmem:[%s570_s2 + $0x8] sm:$0xff]  ;;  %v31_v1 = vld [vmem:[%s570_s2 + $0x18] sm:$0xff]  ;;  %v28_v2 = vld [vmem:[%s570_s2] sm:$0xff]  ;;  %124 = vmatprep.mubr.f32.mxu0 %v376_v7  ;;  %351 = vset.pattern.permute.xlu0 %v377_v8 }
   0x2   :  { %v308_v3 = vpack.c.bf16 %v31_v1, %v29_v0  ;;  %v30_v4 = vld [vmem:[%s570_s2 + $0x10] sm:$0xff]  ;;  %v33_v5 = vld [vmem:[%s570_s2 + $0x28] sm:$0xff]  ;;  %v35_v6 = vld [vmem:[%s570_s2 + $0x38] sm:$0xff] }
   0x3   :  { %v310_v9 = vpack.c.bf16 %v30_v4, %v28_v2  ;;  %v312_v10 = vpack.c.bf16 %v35_v6, %v33_v5  ;;  %v32_v11 = vld [vmem:[%s570_s2 + $0x20] sm:$0xff]  ;;  %v34_v12 = vld [vmem:[%s570_s2 + $0x30] sm:$0xff]  ;;  %v164_v15 = vld [vmem:[%s573_s5 + $0x88] sm:$0xff] }
   0x4   :  { %309 = vmatprep.subr.bf16.mxu0 %v308_v3  ;;  %v36_v13 = vld [vmem:[%s569_s1] sm:$0xff]  ;;  %v314_v16 = vpack.c.bf16 %v34_v12, %v32_v11  ;;  %v148_v19 = vld [vmem:[%s573_s5 + $0x8] sm:$0xff]  ;;  %v165_v20 = vld [vmem:[%s573_s5 + $0x90] sm:$0xff] }
   0x5   :  { %v163_v14 = vld [vmem:[%s573_s5 + $0x80] sm:$0xff]  ;;  %311 = vmatpush1.bf16.msra.mxu0 %v310_v9  ;;  %40 = vperm.xlu0 %351, %v36_v13   ;;  %v166_v22 = vld [vmem:[%s573_s5 + $0x98] sm:$0xff]  ;;  %v149_v23 = vld [vmem:[%s573_s5 + $0x10] sm:$0xff] }
   0x6   :  { %v316_v17 = vpack.c.bf16 %v164_v15, %v163_v14  ;;  %v147_v18 = vld [vmem:[%s573_s5] sm:$0xff]  ;;  %313 = vmatprep.subr.bf16.mxu0 %v312_v10  ;;  %v150_v24 = vld [vmem:[%s573_s5 + $0x18] sm:$0xff]  ;;  %v320_v25 = vpack.c.bf16 %v166_v22, %v165_v20  ;;  %v168_v27 = vld [vmem:[%s573_s5 + $0xa8] sm:$0xff] }
   0x7   :  { %v318_v21 = vpack.c.bf16 %v148_v19, %v147_v18  ;;  %v167_v26 = vld [vmem:[%s573_s5 + $0xa0] sm:$0xff]  ;;  %v322_v28 = vpack.c.bf16 %v150_v24, %v149_v23  ;;  %v152_v32 = vld [vmem:[%s573_s5 + $0x28] sm:$0xff]  ;;  %v169_v33 = vld [vmem:[%s573_s5 + $0xb0] sm:$0xff] }
   0x8   :  { %317 = vmatprep.subr.bf16.mxu1 %v316_v17  ;;  %v27_v29 = vld [vmem:[%s568_s0] sm:$0xff]  ;;  %v324_v30 = vpack.c.bf16 %v168_v27, %v167_v26  ;;  %v170_v34 = vld [vmem:[%s573_s5 + $0xb8] sm:$0xff] }
   0x9   :  { %319 = vmatpush3.bf16.msra.mxu1 %v318_v21  ;;  %315 = vmatpush1.bf16.msra.mxu0 %v314_v16  ;;  %v151_v31 = vld [vmem:[%s573_s5 + $0x20] sm:$0xff] }
   0xa   :  { %321 = vmatprep.subr.bf16.mxu1 %v320_v25  ;;  %v326_v35 = vpack.c.bf16 %v152_v32, %v151_v31 }
   0xc   :  { %271 = vmatmul.mubr.msk.f32.vlgmr.msra.gmra.mrb[0].mxu0 %vm56_vm0, %v27_v29 }
   0xd   :  { %323 = vmatpush3.bf16.msra.mxu1 %v322_v28 }
   0xe   :  { %12 = vsyncpa [#allocation3], 0  ;;  %325 = vmatprep.subr.bf16.mxu1 %v324_v30  ;;  %v328_v36 = vpack.c.bf16 %v170_v34, %v169_v33  ;;  %v153_v37 = vld [vmem:[%s573_s5 + $0x30] sm:$0xff]  ;;  %v154_v38 = vld [vmem:[%s573_s5 + $0x38] sm:$0xff]  ;;  %v44_v0 = vlaneseq }
   0xf   :  { %v171_v39 = vld [vmem:[%s573_s5 + $0xc0] sm:$0xff]  ;;  %v172_v40 = vld [vmem:[%s573_s5 + $0xc8] sm:$0xff]  ;;  %v330_v41 = vpack.c.bf16 %v154_v38, %v153_v37  ;;  %v173_v45 = vld [vmem:[%s573_s5 + $0xd0] sm:$0xff] }
  0x10   :  { %v332_v42 = vpack.c.bf16 %v172_v40, %v171_v39  ;;  %v155_v43 = vld [vmem:[%s573_s5 + $0x40] sm:$0xff]  ;;  %v156_v44 = vld [vmem:[%s573_s5 + $0x48] sm:$0xff]  ;;  %v174_v46 = vld [vmem:[%s573_s5 + $0xd8] sm:$0xff]  ;;  %v45_v1 = vshrl.u32 %v44_v0, 7 }
  0x11   :  { %327 = vmatpush3.bf16.msra.mxu1 %v326_v35  ;;  %v334_v47 = vpack.c.bf16 %v156_v44, %v155_v43  ;;  %v336_v48 = vpack.c.bf16 %v174_v46, %v173_v45  ;;  %v157_v49 = vld [vmem:[%s573_s5 + $0x50] sm:$0xff]  ;;  %v158_v50 = vld [vmem:[%s573_s5 + $0x58] sm:$0xff]  ;;  %v175_v52 = vld [vmem:[%s573_s5 + $0xe0] sm:$0xff] }
  0x12   :  { %329 = vmatprep.subr.bf16.mxu1 %v328_v36  ;;  %v338_v51 = vpack.c.bf16 %v158_v50, %v157_v49  ;;  %v176_v53 = vld [vmem:[%s573_s5 + $0xe8] sm:$0xff]  ;;  %v159_v55 = vld [vmem:[%s573_s5 + $0x60] sm:$0xff]  ;;  %v177_v58 = vld [vmem:[%s573_s5 + $0xf0] sm:$0xff]  ;;  %v46_v2 = vsub.s32 0, %v45_v1  ;;  %v50_v4 = vsub.s32 1, %v45_v1 }
  0x13   :  { %v340_v54 = vpack.c.bf16 %v176_v53, %v175_v52  ;;  %v160_v56 = vld [vmem:[%s573_s5 + $0x68] sm:$0xff]  ;;  %v178_v59 = vld [vmem:[%s573_s5 + $0xf8] sm:$0xff]  ;;  %v161_v61 = vld [vmem:[%s573_s5 + $0x70] sm:$0xff] }
  0x14   :  { %v342_v57 = vpack.c.bf16 %v160_v56, %v159_v55  ;;  %v344_v60 = vpack.c.bf16 %v178_v59, %v177_v58  ;;  %v162_v62 = vld [vmem:[%s573_s5 + $0x78] sm:$0xff]  ;;  %v37_v3 = vld [vmem:[%s571_s3] sm:$0x3] }
  0x15   :  { %331 = vmatpush3.bf16.msra.mxu1 %v330_v41  ;;  %v346_v63 = vpack.c.bf16 %v162_v62, %v161_v61  ;;  %v47_v5 = vrot.slane %v37_v3, %v46_v2  ;;  %v51_v6 = vrot.slane %v37_v3, %v50_v4  ;;  %v131_v8 = vld [vmem:[%s572_s4] sm:$0x3]  ;;  %s378_s4 = smov [#allocation2]  }
  0x16   :  { %333 = vmatprep.subr.bf16.mxu1 %v332_v42  ;;  %v136_v11 = vrot.slane %v131_v8, %v46_v2  ;;  %v140_v13 = vrot.slane %v131_v8, %v50_v4  ;;  %v272_v22 = vld [vmem:[%s574_s6] ss:$0 sm:$0xff]  ;;  %s263_s12 = sshll.u32 %s378_s4, 4  ;;  %s264_s12 = int_to_ptr.vmem [resolvable:$true] %s263_s12 }
  0x17   :  { %s352_s13 = scalar_lea.vmem %s264_s12, 128  ;;  %p357_p1 = scmp.lt.s32.totalorder %s264_s12, %s264_s12 }
  0x18   :  { %p353_p0 = scmp.ne.s32.totalorder %s264_s12, %s352_s13  ;;  %p358_p2 = scmp.lt.s32.totalorder %s352_s13, %s352_s13 }
  0x19   :  { %335 = vmatpush3.bf16.msra.mxu1 %v334_v47 }
  0x1a   :  { %337 = vmatprep.subr.bf16.mxu1 %v336_v48  ;;  %p359_p3 = por %p358_p2, %p357_p1 }
  0x1c   :  { %p360_p4 = pnand %p359_p3, %p353_p0 }
  0x1d   :  { %339 = vmatpush3.bf16.msra.mxu1 %v338_v51 }
  0x1e   :  { %341 = vmatprep.subr.bf16.mxu1 %v340_v54 }
  0x21   :  { %343 = vmatpush3.bf16.msra.mxu1 %v342_v57 }
  0x22   :  { %345 = vmatprep.subr.bf16.mxu1 %v344_v60 }
  0x25   :  { %347 = vmatpush3.bf16.msra.mxu1 %v346_v63 }
  0x84   :  { %v41_v7 = vpop.permute.xlu0 %40 }
  0x85   :  { %v54_v9 = vmul.f32 %v47_v5, %v41_v7  ;;  %v55_v10 = vmul.f32 %v51_v6, %v41_v7 }
  0xdf   :  { %v126_v12 = vpop.f32.mrb[0].mxu0 }
  0xe0   :  { %v127_v14 = vadd.f32 %v126_v12, %v54_v9  ;;  %v128_v15 = vpop.f32.mrb[1].mxu0 }
  0xe1   :  { %v129_v16 = vadd.f32 %v128_v15, %v55_v10 }
  0xe2   :  { %v143_v17 = vadd.f32 %v136_v11, %v127_v14 }
  0xe3   :  { %v144_v18 = vadd.f32 %v140_v13, %v129_v16 }
  0xe4   :  { %v145_v20 = vmax.f32 %v143_v17, 0.0 }
  0xe5   :  { %v146_v19 = vmax.f32 %v144_v18, 0.0 }
  0xe7   :  { %250 = vmatprep.mubr.f32.mxu1 %v146_v19 }
  0xe8   :  { %251 = vmatmul.mubr.f32.vlgmr.msra.gmra.mrb[0].mxu1 %v145_v20 }
 0x1bb   :  { %v305_v21 = vpop.f32.mrb[0].mxu1 }
 0x1bc   :  { %v306_v23 = vpop.f32.mrb[1].mxu1 }
 0x1bd   :  { %v307_v24 = vadd.f32 %v306_v23, %v305_v21 }
 0x1bf   :  { %v253_v25 = vadd.f32 %v307_v24, %v272_v22 }
 0x1c1   :  { %256 = vst.msk [vmem:[#allocation2] sm:$0xff] %vm56_vm0, %v253_v25 }
 0x1c2   :  { %363 = shalt.err (!%p360_p4)
}
 0x1c3   :  { %s364_s16 = scalar_lea.hbm %s575_s7, 128 }
 0x1c4   :  { %p365_p5 = scmp.ne.s32.totalorder %s575_s7, %s364_s16  ;;  %p368_p6 = scmp.lt.u32.totalorder %s364_s16, %s575_s7 }
 0x1c6   :  { %p370_p7 = pnand %p368_p6, %p365_p5 }
 0x1c8   :  { %373 = shalt.err (!%p370_p7)
}
 0x1c9   :  { %266 = dma.vmem_to_hbm [thread:$0]  %s264_s12, 128, %s575_s7, [#allocation3]  }
 0x1ca   :  { %374 = dma.done.wait [#allocation3], 128  }
 0x1cb   :  { %375 = vsyncadd [#allocation3], 4294967168 }
 0x1cc   :  { %270 = vsyncpa [#allocation3], 1 }

</bundles_post_ra>
